<compile_context>
chip_gen: v5e
topology: v5e:2x2
jax: 0.10.0
libtpu: 0.0.40
codegen_flags: <defaults>
</compile_context>

<pallas_src>
import functools

import jax
import jax.numpy as jnp
from jax import lax
from jax.experimental import pallas as pl
from jax.experimental.pallas import tpu as pltpu


def _round_up(a, b):
    return ((a + b - 1) // b) * b


# ----------------------------------------------------------------------------
# Path 1: weight resident in VMEM.  One fused kernel: matmul + pad bias +
# (log-)softmax; logits never touch HBM.
# ----------------------------------------------------------------------------
def _resident_kernel(*refs, log_probs, has_bias):
    if has_bias:
        x_ref, w_ref, bias_ref, out_ref = refs
    else:
        x_ref, w_ref, out_ref = refs
        bias_ref = None

    # x: (bm, H) bf16, w: (V, H) bf16 -> contract last dims (trans-B matmul),
    # accumulate in f32 on the MXU.
    logits = lax.dot_general(
        x_ref[...], w_ref[...],
        dimension_numbers=(((1,), (1,)), ((), ())),
        preferred_element_type=jnp.float32)
    if has_bias:
        logits = logits + bias_ref[...]                 # additive -inf pad mask

    m = jnp.max(logits, axis=-1, keepdims=True)
    shifted = logits - m
    if log_probs:
        denom = jnp.sum(jnp.exp(shifted), axis=-1, keepdims=True)
        out_ref[...] = (shifted - jnp.log(denom)).astype(out_ref.dtype)
    else:
        expv = jnp.exp(shifted)
        denom = jnp.sum(expv, axis=-1, keepdims=True)
        out_ref[...] = (expv * pl.reciprocal(denom, approx=True)).astype(out_ref.dtype)


# ----------------------------------------------------------------------------
# Path 2: vocab-tiled, two passes over V per row tile.
#   pass p==0: online logsumexp (running max m, running sum l) in VMEM scratch
#   pass p==1: recompute logits tile, write normalised output
# ----------------------------------------------------------------------------
def _tiled_kernel(*refs, log_probs, has_bias):
    if has_bias:
        x_ref, w_ref, bias_ref, out_ref, m_ref, l_ref = refs
    else:
        x_ref, w_ref, out_ref, m_ref, l_ref = refs
        bias_ref = None

    p = pl.program_id(1)
    j = pl.program_id(2)

    @pl.when((p == 0) & (j == 0))
    def _():
        m_ref[...] = jnp.full_like(m_ref, -jnp.inf)
        l_ref[...] = jnp.zeros_like(l_ref)

    logits = lax.dot_general(
        x_ref[...], w_ref[...],
        dimension_numbers=(((1,), (1,)), ((), ())),
        preferred_element_type=jnp.float32)
    if has_bias:
        logits = logits + bias_ref[...]

    @pl.when(p == 0)
    def _():
        m_prev = m_ref[...]
        m_new = jnp.maximum(m_prev, jnp.max(logits, axis=-1, keepdims=True))
        l_ref[...] = (l_ref[...] * jnp.exp(m_prev - m_new)
                      + jnp.sum(jnp.exp(logits - m_new), axis=-1, keepdims=True))
        m_ref[...] = m_new

    @pl.when(p == 1)
    def _():
        if log_probs:
            lse = m_ref[...] + jnp.log(l_ref[...])
            out_ref[...] = (logits - lse).astype(out_ref.dtype)
        else:
            out_ref[...] = (jnp.exp(logits - m_ref[...])
                            * pl.reciprocal(l_ref[...], approx=True)
                            ).astype(out_ref.dtype)


# ----------------------------------------------------------------------------
# Generator API.
# ----------------------------------------------------------------------------
@functools.partial(jax.jit, static_argnames=(
    "padding_idx", "log_probs", "block_m", "block_v", "force_vocab_tiling",
    "out_dtype"))
def generator_forward(x, proj_weight, *, padding_idx=-1, log_probs=True,
                      block_m=256, block_v=None, force_vocab_tiling=False,
                      out_dtype=jnp.float32):
    """dl4mt Generator forward.  x: (..., H); proj_weight: (n_words, H)."""
    V, H = proj_weight.shape
    lead = x.shape[:-1]

    # bf16 operands (no-op if already bf16); matmul accumulates in f32.
    x2d = x.reshape(-1, H).astype(jnp.bfloat16)
    w = proj_weight.astype(jnp.bfloat16)                # stays (V, H): no transpose copy
    M = x2d.shape[0]

    # Row tile: sublane (8) aligned; keep >=2 tiles when M allows so the
    # "parallel" row axis can shard across both TensorCores on v7x.
    if M <= 8:
        bm = _round_up(max(M, 1), 8)
    else:
        bm = min(block_m, _round_up((M + 1) // 2, 8))
    m_pad = _round_up(M, bm)
    if m_pad != M:
        x2d = jnp.pad(x2d, ((0, m_pad - M), (0, 0)))
    grid_m = m_pad // bm

    has_bias = padding_idx != -1
    if has_bias:
        bias = jnp.zeros((1, V), jnp.float32).at[0, padding_idx].set(-jnp.inf)

    # Static VMEM estimate for the resident-weight path (bytes).
    resident_est = (2 * bm * H * 2                       # double-buffered x tiles (bf16)
                    + V * H * 2                          # single-buffered weight (bf16)
                    + (V * 4 if has_bias else 0)         # pad-mask bias (f32)
                    + 2 * bm * V * 4                     # double-buffered output tiles (f32)
                    + 2 * bm * V * 4)                    # f32 logits / exp temporaries
    budget = 48 * 1024 * 1024                            # headroom under v7x's 64 MiB

    bv = None
    if force_vocab_tiling or resident_est > budget:
        candidates = (block_v,) if block_v else (2048, 1024, 512, 256, 128)
        for cand in candidates:
            if cand and V % cand == 0:
                bv = cand
                break
    # TODO(synk): vocab sizes with no 128-multiple divisor fall back to the
    # resident path; pad V (and -inf-mask the pad columns) to tile arbitrary V.

    def _vmem_limit(est):
        return int(min(64 * 1024 * 1024, max(32 * 1024 * 1024, 2 * est)))

    if bv is None:
        # -------- resident-weight path --------
        kernel = functools.partial(_resident_kernel, log_probs=log_probs,
                                   has_bias=has_bias)
        in_specs = [
            pl.BlockSpec((bm, H), lambda i: (i, 0)),                     # row tile
            pl.BlockSpec((V, H), lambda i: (0, 0),
                         pipeline_mode=pl.Buffered(1)),                  # resident weight
        ]
        operands = [x2d, w]
        if has_bias:
            in_specs.append(pl.BlockSpec((1, V), lambda i: (0, 0),
                                         pipeline_mode=pl.Buffered(1)))  # resident bias
            operands.append(bias)

        out2d = pl.pallas_call(
            kernel,
            out_shape=jax.ShapeDtypeStruct((m_pad, V), out_dtype),
            grid_spec=pltpu.PrefetchScalarGridSpec(
                num_scalar_prefetch=0,
                grid=(grid_m,),
                in_specs=in_specs,
                out_specs=pl.BlockSpec((bm, V), lambda i: (i, 0)),
            ),
            compiler_params=pltpu.CompilerParams(
                dimension_semantics=("parallel",),
                vmem_limit_bytes=_vmem_limit(resident_est)),
        )(*operands)
    else:
        # -------- vocab-tiled two-pass path --------
        kernel = functools.partial(_tiled_kernel, log_probs=log_probs,
                                   has_bias=has_bias)
        in_specs = [
            pl.BlockSpec((bm, H), lambda i, p, j: (i, 0)),   # row tile (re-used across p, j)
            pl.BlockSpec((bv, H), lambda i, p, j: (j, 0)),   # weight column tile
        ]
        operands = [x2d, w]
        if has_bias:
            in_specs.append(pl.BlockSpec((1, bv), lambda i, p, j: (0, j)))
            operands.append(bias)

        tiled_est = (2 * bm * H * 2 + 2 * bv * H * 2
                     + (2 * bv * 4 if has_bias else 0)
                     + 4 * bm * bv * 4 + 2 * bm * 4 * 2)

        out2d = pl.pallas_call(
            kernel,
            out_shape=jax.ShapeDtypeStruct((m_pad, V), out_dtype),
            grid_spec=pltpu.PrefetchScalarGridSpec(
                num_scalar_prefetch=0,
                grid=(grid_m, 2, V // bv),
                in_specs=in_specs,
                out_specs=pl.BlockSpec((bm, bv), lambda i, p, j: (i, j)),
                scratch_shapes=[pltpu.VMEM((bm, 1), jnp.float32),   # running max
                                pltpu.VMEM((bm, 1), jnp.float32)],  # running sum
            ),
            compiler_params=pltpu.CompilerParams(
                dimension_semantics=("parallel", "arbitrary", "arbitrary"),
                vmem_limit_bytes=_vmem_limit(tiled_est)),
        )(*operands)

    return out2d[:M].reshape(*lead, V)


# ----------------------------------------------------------------------------
# Pure-JAX reference (f32, HIGHEST precision) for a sanity check.
# ----------------------------------------------------------------------------
def reference_forward(x, proj_weight, padding_idx=-1, log_probs=True):
    logits = jnp.einsum("...h,vh->...v", x, proj_weight,
                        precision=lax.Precision.HIGHEST)
    if padding_idx != -1:
        mask = jnp.zeros((proj_weight.shape[0],), jnp.float32)
        mask = mask.at[padding_idx].set(-jnp.inf)
        logits = logits + mask
    if log_probs:
        return jax.nn.log_softmax(logits, axis=-1)
    return jax.nn.softmax(logits, axis=-1)


if __name__ == "__main__":
    n_words, hidden_size = 512, 128
    B, T = 2, 8
    padding_idx = 3

    key = jax.random.PRNGKey(0)
    k_w, k_x = jax.random.split(key)
    # embedding-style init for the (tied) projection weight.
    proj_weight = (0.05 * jax.random.normal(k_w, (n_words, hidden_size))).astype(jnp.float32)
    x = jax.random.normal(k_x, (B, T, hidden_size), dtype=jnp.float32)

    # Resident-weight path.
    logp_r = generator_forward(x, proj_weight, padding_idx=padding_idx, log_probs=True)
    probs_r = generator_forward(x, proj_weight, padding_idx=-1, log_probs=False)
    # Vocab-tiled path (forced at these small shapes to exercise it).
    logp_t = generator_forward(x, proj_weight, padding_idx=padding_idx, log_probs=True,
                               force_vocab_tiling=True, block_v=128)
    probs_t = generator_forward(x, proj_weight, padding_idx=padding_idx, log_probs=False,
                                force_vocab_tiling=True, block_v=128)
    jax.block_until_ready((logp_r, probs_r, logp_t, probs_t))

    ref_logp = reference_forward(x, proj_weight, padding_idx=padding_idx, log_probs=True)
    ref_probs_nopad = reference_forward(x, proj_weight, padding_idx=-1, log_probs=False)
    ref_probs_pad = reference_forward(x, proj_weight, padding_idx=padding_idx, log_probs=False)

    def check_close(a, b, name, atol=1e-2, rtol=1e-2):
        finite = jnp.isfinite(b)
        assert bool(jnp.all(jnp.isfinite(a) == finite)), f"{name}: -inf pattern mismatch"
        assert bool(jnp.allclose(jnp.where(finite, a, 0.0),
                                 jnp.where(finite, b, 0.0),
                                 atol=atol, rtol=rtol)), f"{name}: value mismatch"

    check_close(logp_r, ref_logp, "resident log-probs")
    check_close(probs_r, ref_probs_nopad, "resident probs")
    check_close(logp_t, ref_logp, "tiled log-probs")
    check_close(probs_t, ref_probs_pad, "tiled probs")
    assert bool(jnp.allclose(jnp.sum(probs_r, axis=-1), 1.0, atol=5e-3)), "probs_r not normalized"
    assert bool(jnp.allclose(jnp.sum(probs_t, axis=-1), 1.0, atol=5e-3)), "probs_t not normalized"

    print("KERNEL_OK")
</pallas_src>

<mosaic_0001>
module attributes {stable_mosaic.version = 11 : i64} {
  func.func @_resident_kernel(%arg0: i32, %arg1: memref<8x128xbf16, #tpu.memory_space<vmem>>, %arg2: memref<512x128xbf16, #tpu.memory_space<vmem>>, %arg3: memref<1x512xf32, #tpu.memory_space<vmem>>, %arg4: memref<8x512xf32, #tpu.memory_space<vmem>>) attributes {dimension_semantics = [#tpu.dimension_semantics<parallel>], iteration_bounds = array<i64: 2>, scalar_prefetch = 0 : i64, scratch_operands = 0 : i64, tpu.core_type = #tpu.core_type<tc>, window_params = [{transform_indices = @transform_0, window_bounds = array<i64: 8, 128>}, {pipeline_mode = #tpu.pipeline_mode<synchronous>, transform_indices = @transform_1, window_bounds = array<i64: 512, 128>}, {pipeline_mode = #tpu.pipeline_mode<synchronous>, transform_indices = @transform_2, window_bounds = array<i64: 1, 512>}, {transform_indices = @transform_3, window_bounds = array<i64: 8, 512>}]} {
    %c0 = arith.constant 0 : index
    %c0_0 = arith.constant 0 : index
    %0 = vector.load %arg1[%c0, %c0_0] : memref<8x128xbf16, #tpu.memory_space<vmem>>, vector<8x128xbf16>
    %c0_1 = arith.constant 0 : index
    %c0_2 = arith.constant 0 : index
    %1 = vector.load %arg2[%c0_1, %c0_2] : memref<512x128xbf16, #tpu.memory_space<vmem>>, vector<512x128xbf16>
    %cst = arith.constant dense<0.000000e+00> : vector<8x512xf32>
    %2 = tpu.matmul %0, %1, %cst {dimension_numbers = #tpu.dot_dimension_numbers<[1], [1], [0], [0], [0, 0, 1, 0], [], []>} : vector<8x128xbf16>, vector<512x128xbf16>, vector<8x512xf32> -> vector<8x512xf32>
    %c0_3 = arith.constant 0 : index
    %c0_4 = arith.constant 0 : index
    %3 = vector.load %arg3[%c0_3, %c0_4] : memref<1x512xf32, #tpu.memory_space<vmem>>, vector<1x512xf32>
    %4 = vector.broadcast %3 : vector<1x512xf32> to vector<8x512xf32>
    %5 = arith.addf %2, %4 : vector<8x512xf32>
    %cst_5 = arith.constant dense<0xFF800000> : vector<8xf32>
    %6 = vector.multi_reduction <maximumf>, %5, %cst_5 [1] : vector<8x512xf32> to vector<8xf32>
    %7 = vector.shape_cast %6 : vector<8xf32> to vector<8x1xf32>
    %8 = vector.broadcast %7 : vector<8x1xf32> to vector<8x512xf32>
    %9 = arith.subf %5, %8 : vector<8x512xf32>
    %10 = math.exp %9 : vector<8x512xf32>
    %cst_6 = arith.constant dense<0.000000e+00> : vector<8xf32>
    %11 = vector.multi_reduction <add>, %10, %cst_6 [1] : vector<8x512xf32> to vector<8xf32>
    %12 = vector.shape_cast %11 : vector<8xf32> to vector<8x1xf32>
    %13 = math.log %12 : vector<8x1xf32>
    %14 = vector.broadcast %13 : vector<8x1xf32> to vector<8x512xf32>
    %15 = arith.subf %9, %14 : vector<8x512xf32>
    %c0_7 = arith.constant 0 : index
    %c0_8 = arith.constant 0 : index
    %16 = vector.load %arg4[%c0_7, %c0_8] : memref<8x512xf32, #tpu.memory_space<vmem>>, vector<8x512xf32>
    tpu.vector_store %arg4[%c0_7, %c0_8], %15 {strides = array<i32>} : memref<8x512xf32, #tpu.memory_space<vmem>>, vector<8x512xf32>,
    return
  }
  func.func @transform_0(%arg0: i32) -> (i32, i32) {
    %c0_i32 = arith.constant 0 : i32
    %c0_i32_0 = arith.constant 0 : i32
    return %arg0, %c0_i32 : i32, i32
  }
  func.func @transform_1(%arg0: i32) -> (i32, i32) {
    %c0_i32 = arith.constant 0 : i32
    %c0_i32_0 = arith.constant 0 : i32
    %c0_i32_1 = arith.constant 0 : i32
    return %c0_i32, %c0_i32_0 : i32, i32
  }
  func.func @transform_2(%arg0: i32) -> (i32, i32) {
    %c0_i32 = arith.constant 0 : i32
    %c0_i32_0 = arith.constant 0 : i32
    %c0_i32_1 = arith.constant 0 : i32
    return %c0_i32, %c0_i32_0 : i32, i32
  }
  func.func @transform_3(%arg0: i32) -> (i32, i32) {
    %c0_i32 = arith.constant 0 : i32
    %c0_i32_0 = arith.constant 0 : i32
    return %arg0, %c0_i32 : i32, i32
  }
}

</mosaic_0001>

<bundles_post_ra>
// kernel: generator_forward.1
= control target key start
LH: loop header
LB: loop body
LE: loop exit
PB: predicated region body
PF: predicated region fallthrough
CT: control target
= control target key end

     0   :  { %8 = vsyncpa [#allocation3], 0  ;;  %s1082_s0 = inlined_call_operand.vmem [shape: bf16[16,128], index: 0, kind: input, shape index: {}]   ;;  %s1083_s1 = inlined_call_operand.vmem [shape: bf16[512,128], index: 1, kind: input, shape index: {}]   ;;  %s1084_s2 = inlined_call_operand.vmem [shape: f32[1,512], index: 2, kind: input, shape index: {}]   ;;  %s1085_s3 = inlined_call_operand.hbm [shape: f32[16,512], index: 3, kind: output, shape index: {}]  }
   0x1   :  { %10 = vsyncpa [#allocation3 + $0x1], 0  ;;  %s898_s12 = smov 0   ;;  %s900_s13 = smov 0  }
   0x2   :  { %s902_s14 = smov 0   ;;  %s904_s15 = smov 0  }
   0x3 LB: > { %s919_s16 = sadd.s32 4294967295, %s876_s15   ;;  %s593_s17 = sadd.s32 4294967294, %s876_s15   ;;  %s876_s15 = sphi %s904_s15, %s1091_s15   ;;  %s872_s14 = sphi %s902_s14, %s1090_s14   ;;  %s868_s13 = sphi %s900_s13, %s1089_s13   ;;  %s864_s12 = sphi %s898_s12, %s1088_s12  }
   0x4   : > { %s923_s18 = sadd.s32 1, %s876_s15   ;;  %s91_s19 = sadd.s32 1, %s872_s14 }
   0x5   : > { %s88_s20 = ssub.s32 %s876_s15, %s923_s18  ;;  %p101_p0 = scmp.ne.s32.totalorder %s872_s14, %s868_s13 }
   0x6   : > { %p89_p1 = scmp.eq.s32.totalorder %s88_s20, 0  ;;  %p102_p2 = scmp.eq.s32.totalorder %s919_s16, 1 }
   0x7   : > { %p107_p3 = scmp.ne.s32.totalorder %s868_s13, %s864_s12  ;;  %p108_p4 = scmp.eq.s32.totalorder %s593_s17, 1 }
   0x8   : > { %s934_s21 = scalar_select %p89_p1, %s872_s14, %s91_s19  }
   0x9   : > { %p936_p5 = por %p102_p2, %p101_p0  ;;  %p940_p6 = por %p108_p4, %p107_p3 }
   0xa   : > { %p596_p7 = scmp.ge.s32.totalorder %s876_s15, 1  ;;  %p139_p8 = scmp.lt.s32.totalorder %s876_s15, 3 }
   0xc   : > { %p140_p9 = pnand %p596_p7, %p139_p8 }
   0xd   : > { %p162_p10 = scmp.lt.s32.totalorder (!%p140_p9), %s919_s16, 1  ;;  %s159_s20 = sand.u32 (!%p140_p9), 1, %s868_s13  }
   0xe   : > { %143 = sbr.rel (%p140_p9) target bundleno = 491 (0x1eb), region = 32  ;;  %s597_s24 = sshll.u32 (!%p140_p9), %s159_s20, 5 }
   0xf   : > { %s764_s25 = sshll.u32 (!%p140_p9), %s919_s16, 5  ;;  %s161_s29 = scalar_lea.vmem (!%p140_p9), [#allocation2], %s597_s24 }
  0x10   : > { %s529_s28 = scalar_lea.hbm (!%p140_p9), %s1085_s3, %s764_s25  ;;  %s531_s30 = sshll.u32 (!%p140_p9), %s161_s29, 4  ;;  %s532_s30 = int_to_ptr.vmem [resolvable:$true] %s531_s30 }
  0x11   : > { %s533_s4 = sshll.u32 (!%p140_p9), %s529_s28, 4  ;;  %s834_s9 = scalar_lea.hbm (!%p140_p9), %s1085_s3, 64  ;;  %s534_s4 = int_to_ptr.hbm [resolvable:$true] %s533_s4 }
  0x12   : > { %s828_s5 = sshra.s32 (!%p140_p9), %s534_s4, 4  ;;  %s829_s5 = int_to_ptr.hbm [resolvable:$true] %s828_s5 }
  0x13   : > { %v739_v0 = vld [vmem:[%s1083_s1 + $0x38] sm:$0xff]  ;;  %v738_v4 = vld [vmem:[%s1083_s1 + $0x30] sm:$0xff]  ;;  %v737_v8 = vld [vmem:[%s1083_s1 + $0x28] sm:$0xff]  ;;  %s163_s26 = scalar_select %p162_p10, %s919_s16, 1 }
  0x14   : > { %v747_v1 = vld [vmem:[%s1083_s1 + $0x78] sm:$0xff]  ;;  %433 = vmatpush.bf16.xpose.msra.mxu0 %v739_v0  ;;  %v746_v5 = vld [vmem:[%s1083_s1 + $0x70] sm:$0xff]  ;;  %v745_v9 = vld [vmem:[%s1083_s1 + $0x68] sm:$0xff]  ;;  %s518_s16 = scalar_lea.sflag [#allocation3], %s159_s20  ;;  %s830_s6 = scalar_lea.hbm %s829_s5, 32 }
  0x15   : > { %v755_v2 = vld [vmem:[%s1083_s1 + $0xb8] sm:$0xff]  ;;  %446 = vmatpush.bf16.xpose.msra.mxu1 %v747_v1  ;;  %v754_v6 = vld [vmem:[%s1083_s1 + $0xb0] sm:$0xff]  ;;  %v753_v10 = vld [vmem:[%s1083_s1 + $0xa8] sm:$0xff]  ;;  %s598_s8 = sshll.u32 %s163_s26, 2  ;;  %p831_p11 = scmp.ne.s32.totalorder %s829_s5, %s830_s6 }
  0x16   : > { %v763_v3 = vld [vmem:[%s1083_s1 + $0xf8] sm:$0xff]  ;;  %459 = vmatpush.bf16.xpose.msra.mxu2 %v755_v2  ;;  %v762_v7 = vld [vmem:[%s1083_s1 + $0xf0] sm:$0xff]  ;;  %v761_v11 = vld [vmem:[%s1083_s1 + $0xe8] sm:$0xff]  ;;  %s165_s11 = scalar_lea.vmem %s1082_s0, %s598_s8  ;;  %p835_p0 = scmp.lt.s32.totalorder %s829_s5, %s1085_s3 }
  0x17   : > { %472 = vmatpush.bf16.xpose.msra.mxu3 %v763_v3  ;;  %v736_v12 = vld [vmem:[%s1083_s1 + $0x20] sm:$0xff]  ;;  %v735_v16 = vld [vmem:[%s1083_s1 + $0x18] sm:$0xff]  ;;  %v734_v20 = vld [vmem:[%s1083_s1 + $0x10] sm:$0xff]  ;;  %p832_p12 = pnand %p831_p11, %p936_p5  ;;  %p836_p1 = scmp.lt.s32.totalorder %s834_s9, %s830_s6 }
  0x18   : > { %v744_v13 = vld [vmem:[%s1083_s1 + $0x60] sm:$0xff]  ;;  %v743_v17 = vld [vmem:[%s1083_s1 + $0x58] sm:$0xff]  ;;  %v742_v21 = vld [vmem:[%s1083_s1 + $0x50] sm:$0xff] }
  0x19   : > { %v752_v14 = vld [vmem:[%s1083_s1 + $0xa0] sm:$0xff]  ;;  %v751_v18 = vld [vmem:[%s1083_s1 + $0x98] sm:$0xff]  ;;  %v750_v22 = vld [vmem:[%s1083_s1 + $0x90] sm:$0xff]  ;;  %p833_p13 = pneg %p832_p12  ;;  %p837_p2 = por %p836_p1, %p835_p0 }
  0x1a   : > { %v760_v15 = vld [vmem:[%s1083_s1 + $0xe0] sm:$0xff]  ;;  %v759_v19 = vld [vmem:[%s1083_s1 + $0xd8] sm:$0xff]  ;;  %v758_v23 = vld [vmem:[%s1083_s1 + $0xd0] sm:$0xff] }
  0x1b   : > { %v733_v24 = vld [vmem:[%s1083_s1 + $0x8] sm:$0xff]  ;;  %v732_v28 = vld [vmem:[%s1083_s1] sm:$0xff]  ;;  %p838_p3 = pnand %p837_p2, %p833_p13 }
  0x1c   : > { %434 = vmatpush.bf16.xpose.msra.mxu0 %v738_v4  ;;  %v741_v25 = vld [vmem:[%s1083_s1 + $0x48] sm:$0xff]  ;;  %v740_v29 = vld [vmem:[%s1083_s1 + $0x40] sm:$0xff] }
  0x1d   : > { %447 = vmatpush.bf16.xpose.msra.mxu1 %v746_v5  ;;  %v749_v26 = vld [vmem:[%s1083_s1 + $0x88] sm:$0xff]  ;;  %v748_v30 = vld [vmem:[%s1083_s1 + $0x80] sm:$0xff] }
  0x1e   : > { %460 = vmatpush.bf16.xpose.msra.mxu2 %v754_v6  ;;  %v757_v27 = vld [vmem:[%s1083_s1 + $0xc8] sm:$0xff]  ;;  %v756_v31 = vld [vmem:[%s1083_s1 + $0xc0] sm:$0xff] }
  0x1f   : > { %473 = vmatpush.bf16.xpose.msra.mxu3 %v762_v7  ;;  %v166_v32 = vld [vmem:[%s165_s11] sm:$0xf] }
  0x20   : > { %v231_v33 = vld [vmem:[%s1084_s2] sm:$0xf] }
  0x21   : > { %v233_v34 = vperm.slane %v231_v33, 0  ;;  %v234_v36 = vperm.slane %v231_v33, 1  ;;  %v235_v40 = vperm.slane %v231_v33, 2  ;;  %v236_v41 = vperm.slane %v231_v33, 3 }
  0x24   : > { %435 = vmatpush.bf16.xpose.msra.mxu0 %v737_v8 }
  0x25   : > { %448 = vmatpush.bf16.xpose.msra.mxu1 %v745_v9 }
  0x26   : > { %461 = vmatpush.bf16.xpose.msra.mxu2 %v753_v10 }
  0x27   : > { %474 = vmatpush.bf16.xpose.msra.mxu3 %v761_v11 }
  0x2c   : > { %436 = vmatpush.bf16.xpose.msra.mxu0 %v736_v12 }
  0x2d   : > { %449 = vmatpush.bf16.xpose.msra.mxu1 %v744_v13 }
  0x2e   : > { %462 = vmatpush.bf16.xpose.msra.mxu2 %v752_v14 }
  0x2f   : > { %475 = vmatpush.bf16.xpose.msra.mxu3 %v760_v15 }
  0x34   : > { %437 = vmatpush.bf16.xpose.msra.mxu0 %v735_v16 }
  0x35   : > { %450 = vmatpush.bf16.xpose.msra.mxu1 %v743_v17 }
  0x36   : > { %463 = vmatpush.bf16.xpose.msra.mxu2 %v751_v18 }
  0x37   : > { %476 = vmatpush.bf16.xpose.msra.mxu3 %v759_v19 }
  0x3c   : > { %438 = vmatpush.bf16.xpose.msra.mxu0 %v734_v20 }
  0x3d   : > { %451 = vmatpush.bf16.xpose.msra.mxu1 %v742_v21 }
  0x3e   : > { %464 = vmatpush.bf16.xpose.msra.mxu2 %v750_v22 }
  0x3f   : > { %477 = vmatpush.bf16.xpose.msra.mxu3 %v758_v23 }
  0x44   : > { %439 = vmatpush.bf16.xpose.msra.mxu0 %v733_v24 }
  0x45   : > { %452 = vmatpush.bf16.xpose.msra.mxu1 %v741_v25 }
  0x46   : > { %465 = vmatpush.bf16.xpose.msra.mxu2 %v749_v26 }
  0x47   : > { %478 = vmatpush.bf16.xpose.msra.mxu3 %v757_v27 }
  0x4c   : > { %440 = vmatpush.bf16.xpose.msra.mxu0 %v732_v28 }
  0x4d   : > { %453 = vmatpush.bf16.xpose.msra.mxu1 %v740_v29 }
  0x4e   : > { %466 = vmatpush.bf16.xpose.msra.mxu2 %v748_v30 }
  0x4f   : > { %479 = vmatpush.bf16.xpose.msra.mxu3 %v756_v31 }
  0x53   : > { %441 = vmatmul.bf16.vlgmr.msra.gmra.mxu0 %v166_v32 }
  0x54   : > { %454 = vmatmul.bf16.vlgmr.msra.gmra.mxu1 %v166_v32 }
  0x55   : > { %467 = vmatmul.bf16.vlgmr.msra.gmra.mxu2 %v166_v32 }
  0x56   : > { %480 = vmatmul.bf16.vlgmr.msra.gmra.mxu3 %v166_v32 }
  0xd0   : > { %v442_v35 = vpop.f32.mrf.mxu0 }
  0xd1   : > { %v455_v37 = vpop.f32.mrf.mxu1  ;;  %v443_v38 = vadd.f32 %v442_v35, %v233_v34 }
  0xd2   : > { %v456_v39 = vadd.f32 %v455_v37, %v234_v36 }
  0xd4   : > { %v485_v48 = vmax.f32 %v443_v38, %v456_v39 }
  0xd8   : > { %v468_v42 = vpop.f32.mrf.mxu2  ;;  %v444_v46 = vpop.f32.mrf.mxu0 }
  0xd9   : > { %v481_v43 = vpop.f32.mrf.mxu3  ;;  %v469_v44 = vadd.f32 %v468_v42, %v235_v40  ;;  %v457_v47 = vpop.f32.mrf.mxu1 }
  0xda   : > { %v482_v45 = vadd.f32 %v481_v43, %v236_v41 }
  0xdc   : > { %v486_v49 = vmax.f32 %v469_v44, %v482_v45 }
  0xde   : > { %v487_v50 = vmax.f32 %v485_v48, %v486_v49 }
  0xe0   : > { %488 = vmax.xlane.f32.xlu0 %v487_v50  ;;  %v470_v51 = vpop.f32.mrf.mxu2 }
  0xe1   : > { %v483_v52 = vpop.f32.mrf.mxu3 }
 0x153   : > { %v489_v53 = vpop.xlane.xlu0 %488 }
 0x154   : > { %v490_v54 = vsub.f32 %v443_v38, %v489_v53  ;;  %v491_v55 = vsub.f32 %v456_v39, %v489_v53  ;;  %v492_v56 = vsub.f32 %v469_v44, %v489_v53  ;;  %v493_v57 = vsub.f32 %v482_v45, %v489_v53 }
 0x156   : > { %v494_v58 = vmul.f32 1.442695, %v490_v54  ;;  %v496_v59 = vmul.f32 1.442695, %v491_v55  ;;  %v498_v60 = vmul.f32 1.442695, %v492_v56 }
 0x157   : > { %v500_v61 = vmul.f32 1.442695, %v493_v57 }
 0x158   : > { %804 = vpow2.f32 %v494_v58 }
 0x159   : > { %806 = vpow2.f32 %v496_v59 }
 0x15a   : > { %808 = vpow2.f32 %v498_v60 }
 0x15b   : > { %810 = vpow2.f32 %v500_v61 }
 0x15e   : > { %v805_v62 = vpop.eup %804 }
 0x15f   : > { %v807_v63 = vpop.eup %806 }
 0x160   : > { %v502_v0 = vadd.f32 %v807_v63, %v805_v62  ;;  %v809_v1 = vpop.eup %808 }
 0x161   : > { %v811_v3 = vpop.eup %810 }
 0x162   : > { %v503_v2 = vadd.f32 %v809_v1, %v502_v0 }
 0x164   : > { %v504_v4 = vadd.f32 %v811_v3, %v503_v2 }
 0x166   : > { %505 = vadd.xlane.f32.xlu0 %v504_v4 }
 0x1d9   : > { %v506_v5 = vpop.xlane.xlu0 %505 }
 0x1da   : > { %812 = vlog2.f32 %v506_v5 }
 0x1e0   : > { %v813_v6 = vpop.eup %812 }
 0x1e1   : > { %v508_v7 = vmul.f32 0.6931472, %v813_v6 }
 0x1e3   : > { %v509_v8 = vsub.f32 %v490_v54, %v508_v7  ;;  %v510_v9 = vsub.f32 %v491_v55, %v508_v7  ;;  %v511_v10 = vsub.f32 %v492_v56, %v508_v7  ;;  %v512_v11 = vsub.f32 %v493_v57, %v508_v7 }
 0x1e5   : > { %513 = vst [vmem:[%s161_s29] sm:$0xff] %v509_v8 }
 0x1e6   : > { %514 = vst [vmem:[%s161_s29 + $0x8] sm:$0xff] %v510_v9 }
 0x1e7   : > { %515 = vst [vmem:[%s161_s29 + $0x10] sm:$0xff] %v511_v10 }
 0x1e8   : > { %516 = vst [vmem:[%s161_s29 + $0x18] sm:$0xff] %v512_v11 }
 0x1e9   : > { %841 = shalt.err (!%p838_p3)
}
 0x1ea   : > { %765 = dma.vmem_to_hbm [thread:$0]  (%p936_p5), %s532_s30, 512, %s534_s4, %s518_s16  }
 0x1eb PF: > { %p771_p4 = scmp.ge.s32.totalorder %s876_s15, 2  ;;  %s545_s17 = sand.u32 1, %s864_s12  }
 0x1ec   : > { %s546_s19 = scalar_lea.sflag [#allocation3], %s545_s17 }
 0x1ed   : > { %p768_p7 = pnand %p771_p4, %p940_p6 }
 0x1ef   : > { %p769_p8 = pneg %p768_p7 }
 0x1f1   : > { %859 = dma.done.wait (%p769_p8), %s546_s19, 512  }
 0x1f2   : > { %861 = vsyncadd (%p769_p8), %s546_s19, 4294966784  ;;  %p13_p9 = scmp.ge.s32.totalorder %s923_s18, 4   ;;  %s1088_s12 = smov %s868_s13 }
 0x1f3   : > { %s1089_s13 = smov %s872_s14  ;;  %s1090_s14 = smov %s934_s21 }
 0x1f4   : > { %s1091_s15 = smov %s923_s18  ;;  %15 = sbr.rel (!%p13_p9) target bundleno = 3 (0x3), region = 67 }
 0x1f9   :  { %552 = vsyncpa [#allocation3], 1 }
 0x1fa   :  { %554 = vsyncpa [#allocation3 + $0x1], 1 }

</bundles_post_ra>
